<compile_context>
chip_gen: v6e
topology: v6e:2x2x1
jax: 0.10.0
libtpu: 0.0.40
codegen_flags: <defaults>
</compile_context>

<pallas_src>
import functools

import numpy as np
import jax
import jax.numpy as jnp
from jax.experimental import pallas as pl
from jax.experimental.pallas import tpu as pltpu


def _round_up(x, m):
    return ((x + m - 1) // m) * m


def _layernorm(x, gamma, beta, eps):
    mean = jnp.mean(x, axis=-1, keepdims=True)
    var = jnp.mean((x - mean) ** 2, axis=-1, keepdims=True)
    return gamma * (x - mean) * jax.lax.rsqrt(var + eps) + beta


def _mha_len1_kernel(q_ref, v_ref, w_ref, scales_ref, out_ref, *, eps, d_model):
    """One TB-row batch tile:  out = LayerNorm( v @ W_fused + b_fused + q ).

    len==1 fast path: softmax over a single key is exactly 1, so the attention
    is the identity on the projected V and Q/K projections are elided; the
    V-projection and fc are pre-folded into a single [Dp, Dp] weight.
    q/v/w are bf16; accumulation, residual add and LayerNorm run in f32.
    """
    f32 = jnp.float32

    # Fused projection on the MXU: bf16 operands, f32 accumulation.  [TB, Dp]
    o = jnp.dot(v_ref[...], w_ref[...], preferred_element_type=f32)

    # scales rows: 0 = fused bias, 1 = gamma, 2 = beta (all f32, lane-padded with 0).
    scales = scales_ref[...]                                     # [3, Dp]
    x = o + scales[0:1, :] + q_ref[...].astype(f32)              # bias + residual

    # One-pass LayerNorm statistics: two *independent* cross-lane reductions
    # (they overlap on the XLU; rsqrt rides the EUP slot).  Zero-padded lanes
    # contribute nothing to either sum, so dividing by the true d_model keeps
    # the statistics exact.
    inv_d = 1.0 / d_model
    mean = jnp.sum(x, axis=-1, keepdims=True) * inv_d
    ex2 = jnp.sum(x * x, axis=-1, keepdims=True) * inv_d
    var = jnp.maximum(ex2 - mean * mean, 0.0)

    out_ref[...] = (scales[1:2, :] * (x - mean) * jax.lax.rsqrt(var + eps)
                    + scales[2:3, :]).astype(out_ref.dtype)


def another_mha_forward(q, k, v, params, *, n_head, d_k, d_v, eps=1e-6,
                        block_rows=1024):
    """q, k, v: [B, 1, d_model].  Returns (output [B, 1, D] f32, attn [B*H, 1, 1])."""
    del k  # K (and Q) projections cannot influence the result when len_k == 1.
    if q.ndim != 3:
        raise ValueError("expected [B, L, D] inputs")
    B, L, D = q.shape
    if L != 1:
        # TODO(synk): general len_q/len_k attention (and the mask path) not implemented;
        # the module is documented/used with len == 1 and mask=None.
        raise NotImplementedError("only the documented len == 1 case is implemented")

    f32, bf16 = jnp.float32, jnp.bfloat16

    # --- Fold the two linear layers once, in the wrapper (tiny XLA op) -------
    w_fused = params["wv"].astype(f32) @ params["wfc"].astype(f32)            # [D, D]
    b_fused = (params["bv"].astype(f32) @ params["wfc"].astype(f32)
               + params["bfc"].astype(f32))                                   # [D]
    gamma = params["gamma"].reshape(D).astype(f32)
    beta = params["beta"].reshape(D).astype(f32)

    q2 = q.reshape(B, D).astype(f32)
    v2 = v.reshape(B, D).astype(f32)

    # --- Lane-dense layout: pad the feature dim to a multiple of 128 only when
    # needed (tiny D).  Zero padding keeps matmul/residual/LN stats exact.
    Dp = _round_up(D, 128)
    if Dp != D:
        pad = Dp - D
        q2 = jnp.pad(q2, ((0, 0), (0, pad)))
        v2 = jnp.pad(v2, ((0, 0), (0, pad)))
        w_fused = jnp.pad(w_fused, ((0, pad), (0, pad)))
        b_fused = jnp.pad(b_fused, (0, pad))
        gamma = jnp.pad(gamma, (0, pad))
        beta = jnp.pad(beta, (0, pad))

    # Matmul I/O in bf16; LN/affine params stay f32 (packed into one [3, Dp] slab).
    q2 = q2.astype(bf16)
    v2 = v2.astype(bf16)
    w_fused = w_fused.astype(bf16)
    scales = jnp.stack([b_fused, gamma, beta], axis=0).astype(f32)            # [3, Dp]

    # --- Rows: pad only when B < 8 (sublane minimum); otherwise rely on Pallas
    # masking the ragged last block -> no full-array pad/slice HBM copies.
    Bp = max(B, 8)
    if Bp != B:
        q2 = jnp.pad(q2, ((0, Bp - B), (0, 0)))
        v2 = jnp.pad(v2, ((0, Bp - B), (0, 0)))

    # --- Tile sizing: multiple of 8 rows, >= 2 grid steps when possible (v7x
    # megacore), capped so double-buffered bf16 q/v + f32 out + f32 temporaries
    # + (conservatively double-buffered) weights fit a ~40 MiB VMEM budget.
    vmem_budget = 40 * 1024 * 1024
    weight_bytes = 2 * (Dp * Dp * 2) + 2 * (3 * Dp * 4)
    per_row_bytes = 28 * Dp
    tb_cap = max(8, ((vmem_budget - weight_bytes) // per_row_bytes) // 8 * 8)
    TB = max(8, min(block_rows, _round_up(pl.cdiv(Bp, 2), 8), tb_cap))
    grid = (pl.cdiv(Bp, TB),)

    row_spec = pl.BlockSpec((TB, Dp), lambda i: (i, 0))
    out_spec = pl.BlockSpec((TB, Dp), lambda i: (i, 0))

    cost = pl.CostEstimate(
        flops=int(2 * Bp * Dp * Dp + 10 * Bp * Dp),
        transcendentals=int(Bp),
        bytes_accessed=int(2 * (2 * Bp * Dp) + 4 * Bp * Dp + 2 * Dp * Dp + 4 * 3 * Dp),
    )

    kernel = functools.partial(_mha_len1_kernel, eps=eps, d_model=D)

    def build_call(const_pipeline_mode):
        kw = {} if const_pipeline_mode is None else {"pipeline_mode": const_pipeline_mode}

        def const_spec(shape):
            return pl.BlockSpec(shape, lambda i: (0, 0), **kw)

        return pl.pallas_call(
            kernel,
            grid=grid,
            in_specs=[row_spec, row_spec, const_spec(w_fused.shape),
                      const_spec(scales.shape)],
            out_specs=out_spec,
            # Output stays f32 to preserve the module's output dtype / LN precision.
            out_shape=jax.ShapeDtypeStruct((Bp, Dp), jnp.float32),
            compiler_params=pltpu.CompilerParams(
                dimension_semantics=("parallel",),        # megacore-shards batch tiles
                vmem_limit_bytes=48 * 1024 * 1024),       # above 16/32 MiB defaults, < 64 MiB v7x
            cost_estimate=cost,
        )

    try:
        # Constant-index weight blocks only need a single VMEM buffer.
        out = build_call(pl.Buffered(1))(q2, v2, w_fused, scales)
    except Exception:
        # TODO(synk): per-BlockSpec pipeline_mode unsupported on this jax build;
        # fall back to default double-buffered weight blocks.
        out = build_call(None)(q2, v2, w_fused, scales)

    if Bp != B:
        out = out[:B]
    if Dp != D:
        out = out[:, :D]
    out = out.reshape(B, 1, D)

    # Softmax over a single key is identically 1 -> attn is exactly ones.
    attn = jnp.ones((B * n_head, 1, 1), jnp.float32)
    return out, attn


def init_params(key, n_head, d_model, d_k, d_v):
    ks = jax.random.split(key, 8)
    std_qk = np.sqrt(2.0 / (d_model + d_k))
    std_v = np.sqrt(2.0 / (d_model + d_v))
    xavier_fc = np.sqrt(2.0 / (n_head * d_v + d_model))
    return {
        "wq": jax.random.normal(ks[0], (d_model, n_head * d_k), jnp.float32) * std_qk,
        "bq": jax.random.normal(ks[1], (n_head * d_k,), jnp.float32) * 0.02,
        "wk": jax.random.normal(ks[2], (d_model, n_head * d_k), jnp.float32) * std_qk,
        "bk": jax.random.normal(ks[3], (n_head * d_k,), jnp.float32) * 0.02,
        "wv": jax.random.normal(ks[4], (d_model, n_head * d_v), jnp.float32) * std_v,
        "bv": jax.random.normal(ks[5], (n_head * d_v,), jnp.float32) * 0.02,
        "wfc": jax.random.normal(ks[6], (n_head * d_v, d_model), jnp.float32) * xavier_fc,
        "bfc": jax.random.normal(ks[7], (d_model,), jnp.float32) * 0.02,
        "gamma": jnp.ones((d_model,), jnp.float32),
        "beta": jnp.zeros((d_model,), jnp.float32),
    }


def reference(q, k, v, P, *, n_head, d_k, d_v, eps=1e-6):
    """Pure-JAX f32 reference mirroring the PyTorch forward (full path, no shortcuts)."""
    B, L, D = q.shape
    Q = (q @ P["wq"] + P["bq"]).reshape(B, L, n_head, d_k).transpose(0, 2, 1, 3)
    K = (k @ P["wk"] + P["bk"]).reshape(B, L, n_head, d_k).transpose(0, 2, 1, 3)
    V = (v @ P["wv"] + P["bv"]).reshape(B, L, n_head, d_v).transpose(0, 2, 1, 3)
    s = jnp.einsum("bhqd,bhkd->bhqk", Q, K) / np.sqrt(d_k)
    attn = jax.nn.softmax(s, axis=-1)
    o = jnp.einsum("bhqk,bhkd->bhqd", attn, V).transpose(0, 2, 1, 3)
    o = o.reshape(B, L, n_head * d_v)
    o = o @ P["wfc"] + P["bfc"]
    out = _layernorm(o + q, P["gamma"], P["beta"], eps)
    return out, attn.reshape(B * n_head, L, L)


def kernel_math_reference(q, v, P, *, eps=1e-6):
    """Mirrors the kernel's fused bf16 math exactly (for a tight correctness check)."""
    B, L, D = q.shape
    f32, bf16 = jnp.float32, jnp.bfloat16
    w_fused = P["wv"].astype(f32) @ P["wfc"].astype(f32)
    b_fused = P["bv"].astype(f32) @ P["wfc"].astype(f32) + P["bfc"].astype(f32)
    q2 = q.reshape(B, D).astype(bf16).astype(f32)
    v2 = v.reshape(B, D).astype(bf16)
    o = jnp.dot(v2, w_fused.astype(bf16), preferred_element_type=f32)
    x = o + b_fused + q2
    mean = jnp.mean(x, axis=-1, keepdims=True)
    var = jnp.maximum(jnp.mean(x * x, axis=-1, keepdims=True) - mean * mean, 0.0)
    return P["gamma"] * (x - mean) * jax.lax.rsqrt(var + eps) + P["beta"]


if __name__ == "__main__":
    B, d_model, n_head, d_k, d_v = 2, 32, 4, 8, 8

    key = jax.random.PRNGKey(0)
    kq, kk, kv, kp = jax.random.split(key, 4)
    q = jax.random.normal(kq, (B, 1, d_model), jnp.float32)
    k = jax.random.normal(kk, (B, 1, d_model), jnp.float32)
    v = jax.random.normal(kv, (B, 1, d_model), jnp.float32)
    params = init_params(kp, n_head, d_model, d_k, d_v)

    out, attn = another_mha_forward(q, k, v, params, n_head=n_head, d_k=d_k, d_v=d_v)
    out = jax.block_until_ready(out)
    attn = jax.block_until_ready(attn)

    # TODO(synk): LayerNorm eps assumed 1e-6 (custom LayerNorm); nn.LayerNorm default is 1e-5.
    # Full-path f32 reference: loosened tolerance because the kernel's matmul I/O is bf16.
    out_ref, attn_ref = reference(q, k, v, params, n_head=n_head, d_k=d_k, d_v=d_v)
    np.testing.assert_allclose(np.asarray(out), np.asarray(out_ref), rtol=2e-2, atol=2e-2)
    np.testing.assert_allclose(np.asarray(attn), np.asarray(attn_ref), rtol=1e-6, atol=1e-6)

    # Tight check against a reference that mirrors the kernel's fused bf16 math.
    out_km = kernel_math_reference(q, v, params, eps=1e-6)
    np.testing.assert_allclose(np.asarray(out).reshape(B, d_model), np.asarray(out_km),
                               rtol=1e-4, atol=1e-4)

    assert out.shape == (B, 1, d_model) and attn.shape == (B * n_head, 1, 1)
    print("KERNEL_OK")
</pallas_src>

<mosaic_0001>
module attributes {stable_mosaic.version = 11 : i64} {
  func.func @_mha_len1_kernel(%arg0: i32, %arg1: memref<8x128xbf16, #tpu.memory_space<vmem>>, %arg2: memref<8x128xbf16, #tpu.memory_space<vmem>>, %arg3: memref<128x128xbf16, #tpu.memory_space<vmem>>, %arg4: memref<3x128xf32, #tpu.memory_space<vmem>>, %arg5: memref<8x128xf32, #tpu.memory_space<vmem>>) attributes {dimension_semantics = [#tpu.dimension_semantics<parallel>], iteration_bounds = array<i64: 1>, scalar_prefetch = 0 : i64, scratch_operands = 0 : i64, tpu.core_type = #tpu.core_type<tc>, window_params = [{transform_indices = @transform_0, window_bounds = array<i64: 8, 128>}, {transform_indices = @transform_1, window_bounds = array<i64: 8, 128>}, {pipeline_mode = #tpu.pipeline_mode<synchronous>, transform_indices = @transform_2, window_bounds = array<i64: 128, 128>}, {pipeline_mode = #tpu.pipeline_mode<synchronous>, transform_indices = @transform_3, window_bounds = array<i64: 3, 128>}, {transform_indices = @transform_4, window_bounds = array<i64: 8, 128>}]} {
    %c0 = arith.constant 0 : index
    %c0_0 = arith.constant 0 : index
    %0 = vector.load %arg2[%c0, %c0_0] : memref<8x128xbf16, #tpu.memory_space<vmem>>, vector<8x128xbf16>
    %c0_1 = arith.constant 0 : index
    %c0_2 = arith.constant 0 : index
    %1 = vector.load %arg3[%c0_1, %c0_2] : memref<128x128xbf16, #tpu.memory_space<vmem>>, vector<128x128xbf16>
    %cst = arith.constant dense<0.000000e+00> : vector<8x128xf32>
    %2 = tpu.matmul %0, %1, %cst {dimension_numbers = #tpu.dot_dimension_numbers<[1], [0], [0], [1], [0, 0, 1, 1], [], []>} : vector<8x128xbf16>, vector<128x128xbf16>, vector<8x128xf32> -> vector<8x128xf32>
    %c0_3 = arith.constant 0 : index
    %c0_4 = arith.constant 0 : index
    %3 = vector.load %arg4[%c0_3, %c0_4] : memref<3x128xf32, #tpu.memory_space<vmem>>, vector<3x128xf32>
    %4 = vector.extract_strided_slice %3 {offsets = [0, 0], sizes = [1, 128], strides = [1, 1]} : vector<3x128xf32> to vector<1x128xf32>
    %5 = vector.broadcast %4 : vector<1x128xf32> to vector<8x128xf32>
    %6 = arith.addf %2, %5 : vector<8x128xf32>
    %c0_5 = arith.constant 0 : index
    %c0_6 = arith.constant 0 : index
    %7 = vector.load %arg1[%c0_5, %c0_6] : memref<8x128xbf16, #tpu.memory_space<vmem>>, vector<8x128xbf16>
    %8 = arith.extf %7 : vector<8x128xbf16> to vector<8x128xf32>
    %9 = arith.addf %6, %8 : vector<8x128xf32>
    %cst_7 = arith.constant dense<0.000000e+00> : vector<8xf32>
    %10 = vector.multi_reduction <add>, %9, %cst_7 [1] : vector<8x128xf32> to vector<8xf32>
    %11 = vector.shape_cast %10 : vector<8xf32> to vector<8x1xf32>
    %cst_8 = arith.constant 3.125000e-02 : f32
    %12 = vector.broadcast %cst_8 : f32 to vector<8x1xf32>
    %13 = arith.mulf %11, %12 : vector<8x1xf32>
    %14 = arith.mulf %9, %9 : vector<8x128xf32>
    %cst_9 = arith.constant dense<0.000000e+00> : vector<8xf32>
    %15 = vector.multi_reduction <add>, %14, %cst_9 [1] : vector<8x128xf32> to vector<8xf32>
    %16 = vector.shape_cast %15 : vector<8xf32> to vector<8x1xf32>
    %cst_10 = arith.constant 3.125000e-02 : f32
    %17 = vector.broadcast %cst_10 : f32 to vector<8x1xf32>
    %18 = arith.mulf %16, %17 : vector<8x1xf32>
    %19 = arith.mulf %13, %13 : vector<8x1xf32>
    %20 = arith.subf %18, %19 : vector<8x1xf32>
    %cst_11 = arith.constant 0.000000e+00 : f32
    %21 = vector.broadcast %cst_11 : f32 to vector<8x1xf32>
    %22 = arith.maximumf %20, %21 : vector<8x1xf32>
    %23 = vector.extract_strided_slice %3 {offsets = [1, 0], sizes = [1, 128], strides = [1, 1]} : vector<3x128xf32> to vector<1x128xf32>
    %24 = vector.broadcast %13 : vector<8x1xf32> to vector<8x128xf32>
    %25 = arith.subf %9, %24 : vector<8x128xf32>
    %26 = vector.broadcast %23 : vector<1x128xf32> to vector<8x128xf32>
    %27 = arith.mulf %26, %25 : vector<8x128xf32>
    %cst_12 = arith.constant 9.99999997E-7 : f32
    %28 = vector.broadcast %cst_12 : f32 to vector<8x1xf32>
    %29 = arith.addf %22, %28 : vector<8x1xf32>
    %30 = math.rsqrt %29 : vector<8x1xf32>
    %31 = vector.broadcast %30 : vector<8x1xf32> to vector<8x128xf32>
    %32 = arith.mulf %27, %31 : vector<8x128xf32>
    %33 = vector.extract_strided_slice %3 {offsets = [2, 0], sizes = [1, 128], strides = [1, 1]} : vector<3x128xf32> to vector<1x128xf32>
    %34 = vector.broadcast %33 : vector<1x128xf32> to vector<8x128xf32>
    %35 = arith.addf %32, %34 : vector<8x128xf32>
    %c0_13 = arith.constant 0 : index
    %c0_14 = arith.constant 0 : index
    %36 = vector.load %arg5[%c0_13, %c0_14] : memref<8x128xf32, #tpu.memory_space<vmem>>, vector<8x128xf32>
    tpu.vector_store %arg5[%c0_13, %c0_14], %35 {strides = array<i32>} : memref<8x128xf32, #tpu.memory_space<vmem>>, vector<8x128xf32>,
    return
  }
  func.func @transform_0(%arg0: i32) -> (i32, i32) {
    %c0_i32 = arith.constant 0 : i32
    %c0_i32_0 = arith.constant 0 : i32
    return %arg0, %c0_i32 : i32, i32
  }
  func.func @transform_1(%arg0: i32) -> (i32, i32) {
    %c0_i32 = arith.constant 0 : i32
    %c0_i32_0 = arith.constant 0 : i32
    return %arg0, %c0_i32 : i32, i32
  }
  func.func @transform_2(%arg0: i32) -> (i32, i32) {
    %c0_i32 = arith.constant 0 : i32
    %c0_i32_0 = arith.constant 0 : i32
    %c0_i32_1 = arith.constant 0 : i32
    return %c0_i32, %c0_i32_0 : i32, i32
  }
  func.func @transform_3(%arg0: i32) -> (i32, i32) {
    %c0_i32 = arith.constant 0 : i32
    %c0_i32_0 = arith.constant 0 : i32
    %c0_i32_1 = arith.constant 0 : i32
    return %c0_i32, %c0_i32_0 : i32, i32
  }
  func.func @transform_4(%arg0: i32) -> (i32, i32) {
    %c0_i32 = arith.constant 0 : i32
    %c0_i32_0 = arith.constant 0 : i32
    return %arg0, %c0_i32 : i32, i32
  }
}

module attributes {stable_mosaic.version = 11 : i64} {
  func.func @_mha_len1_kernel(%arg0: i32, %arg1: memref<8x128xbf16, #tpu.memory_space<vmem>>, %arg2: memref<8x128xbf16, #tpu.memory_space<vmem>>, %arg3: memref<128x128xbf16, #tpu.memory_space<vmem>>, %arg4: memref<3x128xf32, #tpu.memory_space<vmem>>, %arg5: memref<8x128xf32, #tpu.memory_space<vmem>>) attributes {dimension_semantics = [#tpu.dimension_semantics<parallel>], iteration_bounds = array<i64: 1>, scalar_prefetch = 0 : i64, scratch_operands = 0 : i64, tpu.core_type = #tpu.core_type<tc>, window_params = [{transform_indices = @transform_0, window_bounds = array<i64: 8, 128>}, {transform_indices = @transform_1, window_bounds = array<i64: 8, 128>}, {pipeline_mode = #tpu.pipeline_mode<synchronous>, transform_indices = @transform_2, window_bounds = array<i64: 128, 128>}, {pipeline_mode = #tpu.pipeline_mode<synchronous>, transform_indices = @transform_3, window_bounds = array<i64: 3, 128>}, {transform_indices = @transform_4, window_bounds = array<i64: 8, 128>}]} {
    %c0 = arith.constant 0 : index
    %c0_0 = arith.constant 0 : index
    %0 = vector.load %arg2[%c0, %c0_0] : memref<8x128xbf16, #tpu.memory_space<vmem>>, vector<8x128xbf16>
    %c0_1 = arith.constant 0 : index
    %c0_2 = arith.constant 0 : index
    %1 = vector.load %arg3[%c0_1, %c0_2] : memref<128x128xbf16, #tpu.memory_space<vmem>>, vector<128x128xbf16>
    %cst = arith.constant dense<0.000000e+00> : vector<8x128xf32>
    %2 = tpu.matmul %0, %1, %cst {dimension_numbers = #tpu.dot_dimension_numbers<[1], [0], [0], [1], [0, 0, 1, 1], [], []>} : vector<8x128xbf16>, vector<128x128xbf16>, vector<8x128xf32> -> vector<8x128xf32>
    %c0_3 = arith.constant 0 : index
    %c0_4 = arith.constant 0 : index
    %3 = vector.load %arg4[%c0_3, %c0_4] : memref<3x128xf32, #tpu.memory_space<vmem>>, vector<3x128xf32>
    %4 = vector.extract_strided_slice %3 {offsets = [0, 0], sizes = [1, 128], strides = [1, 1]} : vector<3x128xf32> to vector<1x128xf32>
    %5 = vector.broadcast %4 : vector<1x128xf32> to vector<8x128xf32>
    %6 = arith.addf %2, %5 : vector<8x128xf32>
    %c0_5 = arith.constant 0 : index
    %c0_6 = arith.constant 0 : index
    %7 = vector.load %arg1[%c0_5, %c0_6] : memref<8x128xbf16, #tpu.memory_space<vmem>>, vector<8x128xbf16>
    %8 = arith.extf %7 : vector<8x128xbf16> to vector<8x128xf32>
    %9 = arith.addf %6, %8 : vector<8x128xf32>
    %cst_7 = arith.constant dense<0.000000e+00> : vector<8xf32>
    %10 = vector.multi_reduction <add>, %9, %cst_7 [1] : vector<8x128xf32> to vector<8xf32>
    %11 = vector.shape_cast %10 : vector<8xf32> to vector<8x1xf32>
    %cst_8 = arith.constant 3.125000e-02 : f32
    %12 = vector.broadcast %cst_8 : f32 to vector<8x1xf32>
    %13 = arith.mulf %11, %12 : vector<8x1xf32>
    %14 = arith.mulf %9, %9 : vector<8x128xf32>
    %cst_9 = arith.constant dense<0.000000e+00> : vector<8xf32>
    %15 = vector.multi_reduction <add>, %14, %cst_9 [1] : vector<8x128xf32> to vector<8xf32>
    %16 = vector.shape_cast %15 : vector<8xf32> to vector<8x1xf32>
    %cst_10 = arith.constant 3.125000e-02 : f32
    %17 = vector.broadcast %cst_10 : f32 to vector<8x1xf32>
    %18 = arith.mulf %16, %17 : vector<8x1xf32>
    %19 = arith.mulf %13, %13 : vector<8x1xf32>
    %20 = arith.subf %18, %19 : vector<8x1xf32>
    %cst_11 = arith.constant 0.000000e+00 : f32
    %21 = vector.broadcast %cst_11 : f32 to vector<8x1xf32>
    %22 = arith.maximumf %20, %21 : vector<8x1xf32>
    %23 = vector.extract_strided_slice %3 {offsets = [1, 0], sizes = [1, 128], strides = [1, 1]} : vector<3x128xf32> to vector<1x128xf32>
    %24 = vector.broadcast %13 : vector<8x1xf32> to vector<8x128xf32>
    %25 = arith.subf %9, %24 : vector<8x128xf32>
    %26 = vector.broadcast %23 : vector<1x128xf32> to vector<8x128xf32>
    %27 = arith.mulf %26, %25 : vector<8x128xf32>
    %cst_12 = arith.constant 9.99999997E-7 : f32
    %28 = vector.broadcast %cst_12 : f32 to vector<8x1xf32>
    %29 = arith.addf %22, %28 : vector<8x1xf32>
    %30 = math.rsqrt %29 : vector<8x1xf32>
    %31 = vector.broadcast %30 : vector<8x1xf32> to vector<8x128xf32>
    %32 = arith.mulf %27, %31 : vector<8x128xf32>
    %33 = vector.extract_strided_slice %3 {offsets = [2, 0], sizes = [1, 128], strides = [1, 1]} : vector<3x128xf32> to vector<1x128xf32>
    %34 = vector.broadcast %33 : vector<1x128xf32> to vector<8x128xf32>
    %35 = arith.addf %32, %34 : vector<8x128xf32>
    %c0_13 = arith.constant 0 : index
    %c0_14 = arith.constant 0 : index
    %36 = vector.load %arg5[%c0_13, %c0_14] : memref<8x128xf32, #tpu.memory_space<vmem>>, vector<8x128xf32>
    tpu.vector_store %arg5[%c0_13, %c0_14], %35 {strides = array<i32>} : memref<8x128xf32, #tpu.memory_space<vmem>>, vector<8x128xf32>,
    return
  }
  func.func @transform_0(%arg0: i32) -> (i32, i32) {
    %c0_i32 = arith.constant 0 : i32
    %c0_i32_0 = arith.constant 0 : i32
    return %arg0, %c0_i32 : i32, i32
  }
  func.func @transform_1(%arg0: i32) -> (i32, i32) {
    %c0_i32 = arith.constant 0 : i32
    %c0_i32_0 = arith.constant 0 : i32
    return %arg0, %c0_i32 : i32, i32
  }
  func.func @transform_2(%arg0: i32) -> (i32, i32) {
    %c0_i32 = arith.constant 0 : i32
    %c0_i32_0 = arith.constant 0 : i32
    %c0_i32_1 = arith.constant 0 : i32
    return %c0_i32, %c0_i32_0 : i32, i32
  }
  func.func @transform_3(%arg0: i32) -> (i32, i32) {
    %c0_i32 = arith.constant 0 : i32
    %c0_i32_0 = arith.constant 0 : i32
    %c0_i32_1 = arith.constant 0 : i32
    return %c0_i32, %c0_i32_0 : i32, i32
  }
  func.func @transform_4(%arg0: i32) -> (i32, i32) {
    %c0_i32 = arith.constant 0 : i32
    %c0_i32_0 = arith.constant 0 : i32
    return %arg0, %c0_i32 : i32, i32
  }
}

</mosaic_0001>

<bundles_post_ra>
// kernel: tpu_custom_call.1
= control target key start
LH: loop header
LB: loop body
LE: loop exit
PB: predicated region body
PF: predicated region fallthrough
CT: control target
= control target key end

     0   :  { %9 = vsyncpa [#allocation3], 0  ;;  %s399_s0 = inlined_call_operand.hbm [shape: bf16[8,128], index: 0, kind: input, shape index: {}]   ;;  %s400_s1 = inlined_call_operand.hbm [shape: bf16[8,128], index: 1, kind: input, shape index: {}]   ;;  %s401_s2 = inlined_call_operand.hbm [shape: bf16[128,128], index: 2, kind: input, shape index: {}]   ;;  %s402_s3 = inlined_call_operand.vmem [shape: f32[3,128], index: 3, kind: input, shape index: {}]   ;;  %s403_s4 = inlined_call_operand.hbm [shape: f32[8,128], index: 4, kind: output, shape index: {}]  }
   0x1   :  { %10 = vsyncpa [#allocation6], 0 }
   0x2   :  { %11 = vsyncpa [#allocation4], 0  ;;  %s351_s15 = smov [#allocation5]   ;;  %s352_s17 = smov [#allocation2]  }
   0x3   :  { %s28_s16 = sshll.u32 %s351_s15, 4  ;;  %s18_s18 = sshll.u32 %s352_s17, 4  ;;  %s29_s16 = int_to_ptr.vmem [resolvable:$true] %s28_s16  ;;  %s19_s18 = int_to_ptr.vmem [resolvable:$true] %s18_s18 }
   0x4   :  { %s273_s19 = scalar_lea.vmem %s29_s16, 64  ;;  %p278_p1 = scmp.lt.s32.totalorder %s29_s16, %s29_s16 }
   0x5   :  { %p274_p0 = scmp.ne.s32.totalorder %s29_s16, %s273_s19  ;;  %p279_p2 = scmp.lt.s32.totalorder %s273_s19, %s273_s19 }
   0x7   :  { %p280_p3 = por %p279_p2, %p278_p1 }
   0x9   :  { %p281_p4 = pnand %p280_p3, %p274_p0 }
   0xb   :  { %284 = shalt.err (!%p281_p4)
}
   0xc   :  { %31 = dma.hbm_to_vmem [thread:$0]  %s400_s1, 64, %s29_s16, [#allocation6]  }
   0xd   :  { %s293_s22 = scalar_lea.vmem %s19_s18, 64  ;;  %p298_p6 = scmp.lt.s32.totalorder %s19_s18, %s19_s18 }
   0xe   :  { %p294_p5 = scmp.ne.s32.totalorder %s19_s18, %s293_s22  ;;  %p299_p7 = scmp.lt.s32.totalorder %s293_s22, %s293_s22 }
  0x10   :  { %p300_p8 = por %p299_p7, %p298_p6 }
  0x12   :  { %p301_p9 = pnand %p300_p8, %p294_p5 }
  0x14   :  { %304 = shalt.err (!%p301_p9)
}
  0x15   :  { %21 = dma.hbm_to_vmem [thread:$0]  %s399_s0, 64, %s19_s18, [#allocation3]  }
  0x16   :  { %s353_s25 = smov [#allocation7]  }
  0x17   :  { %s37_s26 = sshll.u32 %s353_s25, 4  ;;  %s38_s26 = int_to_ptr.vmem [resolvable:$true] %s37_s26 }
  0x18   :  { %s313_s27 = scalar_lea.vmem %s38_s26, 1024  ;;  %p318_p11 = scmp.lt.s32.totalorder %s38_s26, %s38_s26 }
  0x19   :  { %p314_p10 = scmp.ne.s32.totalorder %s38_s26, %s313_s27  ;;  %p319_p12 = scmp.lt.s32.totalorder %s313_s27, %s313_s27 }
  0x1b   :  { %p320_p13 = por %p319_p12, %p318_p11 }
  0x1d   :  { %p321_p0 = pnand %p320_p13, %p314_p10 }
  0x1f   :  { %324 = shalt.err (!%p321_p0)
}
  0x20   :  { %s354_s1 = smov 64   ;;  %s355_s28 = smov 4  }
  0x21   :  { %43 = dma.hbm_to_vmem [thread:$0]  %s401_s2, 1024, %s38_s26, [#allocation6], %s354_s1, %s354_s1, %s355_s28  }
  0x22   :  { %345 = dma.done.wait [#allocation3], 64  }
  0x23   :  { %346 = vsyncadd [#allocation3], 4294967232 }
  0x24   :  { %347 = dma.done.wait [#allocation6], 1088  }
  0x25   :  { %348 = vsyncadd [#allocation6], 4294966208  ;;  %v356_v0 = vmov 0.0   ;;  %vm357_vm0 = vmmov 0   ;;  %v255_v1 = vld [vmem:[#allocation7 + $0x38] sm:$0xff]   ;;  %v256_v2 = vld [vmem:[#allocation7 + $0x30] sm:$0xff]   ;;  %v74_v10 = vlaneseq }
  0x26   :  { %227 = vmatprep.subr.bf16.mxu0 %v356_v0  ;;  %243 = vmatprep.mubr.msk.bf16.mxu0 %vm357_vm0, %v356_v0  ;;  %v257_v3 = vld [vmem:[#allocation7 + $0x28] sm:$0xff]   ;;  %v258_v4 = vld [vmem:[#allocation7 + $0x20] sm:$0xff]   ;;  %v259_v5 = vld [vmem:[#allocation7 + $0x18] sm:$0xff]  }
  0x27   :  { %228 = vmatpush3.bf16.msra.mxu0 %v255_v1  ;;  %v260_v6 = vld [vmem:[#allocation7 + $0x10] sm:$0xff]   ;;  %v261_v7 = vld [vmem:[#allocation7 + $0x8] sm:$0xff]   ;;  %v262_v8 = vld [vmem:[#allocation7] sm:$0xff]   ;;  %v75_v11 = vshrl.u32 %v74_v10, 7 }
  0x28   :  { %229 = vmatprep.subr.bf16.mxu0 %v356_v0  ;;  %v56_v9 = vld [vmem:[#allocation5] sm:$0xf]  ;;  %v73_v13 = vld [vmem:[%s402_s3] sm:$0x7]  ;;  %s358_s3 = smov [#allocation8]  }
  0x29   :  { %v76_v12 = vsub.s32 0, %v75_v11  ;;  %v166_v14 = vld [vmem:[#allocation2] sm:$0xf]  ;;  %v182_v32 = vsub.s32 1, %v75_v11  ;;  %v190_v35 = vsub.s32 2, %v75_v11  ;;  %s200_s5 = sshll.u32 %s358_s3, 4  ;;  %s201_s5 = int_to_ptr.vmem [resolvable:$true] %s200_s5 }
  0x2a   :  { %v167_v16 = vunpack.c.l.bf16 %v166_v14  ;;  %s325_s6 = scalar_lea.vmem %s201_s5, 128  ;;  %p330_p2 = scmp.lt.s32.totalorder %s201_s5, %s201_s5 }
  0x2b   :  { %230 = vmatpush3.bf16.msra.mxu0 %v256_v2  ;;  %v77_v15 = vrot.slane %v73_v13, %v76_v12  ;;  %v183_v33 = vrot.slane %v73_v13, %v182_v32  ;;  %v191_v37 = vrot.slane %v73_v13, %v190_v35  ;;  %p326_p1 = scmp.ne.s32.totalorder %s201_s5, %s325_s6  ;;  %p331_p3 = scmp.lt.s32.totalorder %s325_s6, %s325_s6 }
  0x2c   :  { %231 = vmatprep.subr.bf16.mxu0 %v356_v0 }
  0x2d   :  { %p332_p4 = por %p331_p3, %p330_p2 }
  0x2f   :  { %232 = vmatpush3.bf16.msra.mxu0 %v257_v3  ;;  %p333_p5 = pnand %p332_p4, %p326_p1 }
  0x30   :  { %233 = vmatprep.subr.bf16.mxu0 %v356_v0 }
  0x33   :  { %234 = vmatpush3.bf16.msra.mxu0 %v258_v4 }
  0x34   :  { %235 = vmatprep.subr.bf16.mxu0 %v356_v0 }
  0x37   :  { %236 = vmatpush3.bf16.msra.mxu0 %v259_v5 }
  0x38   :  { %237 = vmatprep.subr.bf16.mxu0 %v356_v0 }
  0x3b   :  { %238 = vmatpush3.bf16.msra.mxu0 %v260_v6 }
  0x3c   :  { %239 = vmatprep.subr.bf16.mxu0 %v356_v0 }
  0x3f   :  { %240 = vmatpush3.bf16.msra.mxu0 %v261_v7 }
  0x40   :  { %241 = vmatprep.subr.bf16.mxu0 %v356_v0 }
  0x43   :  { %242 = vmatpush3.bf16.msra.mxu0 %v262_v8 }
  0x46   :  { %244 = vmatmul.mubr.bf16.vlgmr.msra.gmra.mxu0 %v56_v9 }
 0x106   :  { %v160_v17 = vpop.f32.mrf.mxu0 }
 0x107   :  { %v161_v18 = vadd.f32 %v160_v17, %v77_v15 }
 0x108   :  { %v245_v19 = vpop.f32.mrf.mxu0 }
 0x109   :  { %v168_v20 = vadd.f32 %v167_v16, %v161_v18 }
 0x10a   :  { %v163_v21 = vpop.f32.mrf.mxu0 }
 0x10b   :  { %169 = vadd.xlane.f32.xlu0 %v168_v20  ;;  %v172_v23 = vmul.f32 %v168_v20, %v168_v20 }
 0x10c   :  { %v246_v22 = vpop.f32.mrf.mxu0 }
 0x10f   :  { %173 = vadd.xlane.f32.xlu0 %v172_v23 }
 0x194   :  { %v170_v24 = vpop.xlane.xlu0 %169 }
 0x195   :  { %v171_v25 = vmul.f32 0.03125, %v170_v24 }
 0x197   :  { %v176_v27 = vmul.f32 %v171_v25, %v171_v25  ;;  %v179_v34 = vsub.f32 %v168_v20, %v171_v25 }
 0x198   :  { %v174_v26 = vpop.xlane.xlu0 %173 }
 0x199   :  { %v175_v28 = vmul.f32 0.03125, %v174_v26  ;;  %v184_v36 = vmul.f32 %v183_v33, %v179_v34 }
 0x19b   :  { %v177_v29 = vsub.f32 %v175_v28, %v176_v27 }
 0x19d   :  { %v178_v30 = vmax.f32 %v177_v29, 0.0 }
 0x19f   :  { %v185_v31 = vadd.f32 1e-06, %v178_v30 }
 0x1a1   :  { %263 = vrsqrt.f32 %v185_v31 }
 0x1ae   :  { %v264_v38 = vpop.eup %263 }
 0x1af   :  { %v187_v39 = vmul.f32 %v264_v38, %v184_v36 }
 0x1b1   :  { %v192_v40 = vadd.f32 %v191_v37, %v187_v39 }
 0x1b3   :  { %193 = vst [vmem:[#allocation8] sm:$0xff] %v192_v40 }
 0x1b4   :  { %336 = shalt.err (!%p333_p5)
}
 0x1b5   :  { %203 = dma.vmem_to_hbm [thread:$0]  %s201_s5, 128, %s403_s4, [#allocation4]  }
 0x1b6   :  { %349 = dma.done.wait [#allocation4], 128  }
 0x1b7   :  { %350 = vsyncadd [#allocation4], 4294967168 }
 0x1b8   :  { %207 = vsyncpa [#allocation3], 1 }
 0x1b9   :  { %208 = vsyncpa [#allocation6], 1 }
 0x1ba   :  { %209 = vsyncpa [#allocation4], 1 }

// kernel: tpu_custom_call.1
= control target key start
LH: loop header
LB: loop body
LE: loop exit
PB: predicated region body
PF: predicated region fallthrough
CT: control target
= control target key end

     0   :  { %9 = vsyncpa [#allocation3], 0  ;;  %s399_s0 = inlined_call_operand.hbm [shape: bf16[8,128], index: 0, kind: input, shape index: {}]   ;;  %s400_s1 = inlined_call_operand.hbm [shape: bf16[8,128], index: 1, kind: input, shape index: {}]   ;;  %s401_s2 = inlined_call_operand.hbm [shape: bf16[128,128], index: 2, kind: input, shape index: {}]   ;;  %s402_s3 = inlined_call_operand.vmem [shape: f32[3,128], index: 3, kind: input, shape index: {}]   ;;  %s403_s4 = inlined_call_operand.hbm [shape: f32[8,128], index: 4, kind: output, shape index: {}]  }
   0x1   :  { %10 = vsyncpa [#allocation6], 0 }
   0x2   :  { %11 = vsyncpa [#allocation4], 0  ;;  %s351_s15 = smov [#allocation5]   ;;  %s352_s17 = smov [#allocation2]  }
   0x3   :  { %s28_s16 = sshll.u32 %s351_s15, 4  ;;  %s18_s18 = sshll.u32 %s352_s17, 4  ;;  %s29_s16 = int_to_ptr.vmem [resolvable:$true] %s28_s16  ;;  %s19_s18 = int_to_ptr.vmem [resolvable:$true] %s18_s18 }
   0x4   :  { %s273_s19 = scalar_lea.vmem %s29_s16, 64  ;;  %p278_p1 = scmp.lt.s32.totalorder %s29_s16, %s29_s16 }
   0x5   :  { %p274_p0 = scmp.ne.s32.totalorder %s29_s16, %s273_s19  ;;  %p279_p2 = scmp.lt.s32.totalorder %s273_s19, %s273_s19 }
   0x7   :  { %p280_p3 = por %p279_p2, %p278_p1 }
   0x9   :  { %p281_p4 = pnand %p280_p3, %p274_p0 }
   0xb   :  { %284 = shalt.err (!%p281_p4)
}
   0xc   :  { %31 = dma.hbm_to_vmem [thread:$0]  %s400_s1, 64, %s29_s16, [#allocation6]  }
   0xd   :  { %s293_s22 = scalar_lea.vmem %s19_s18, 64  ;;  %p298_p6 = scmp.lt.s32.totalorder %s19_s18, %s19_s18 }
   0xe   :  { %p294_p5 = scmp.ne.s32.totalorder %s19_s18, %s293_s22  ;;  %p299_p7 = scmp.lt.s32.totalorder %s293_s22, %s293_s22 }
  0x10   :  { %p300_p8 = por %p299_p7, %p298_p6 }
  0x12   :  { %p301_p9 = pnand %p300_p8, %p294_p5 }
  0x14   :  { %304 = shalt.err (!%p301_p9)
}
  0x15   :  { %21 = dma.hbm_to_vmem [thread:$0]  %s399_s0, 64, %s19_s18, [#allocation3]  }
  0x16   :  { %s353_s25 = smov [#allocation7]  }
  0x17   :  { %s37_s26 = sshll.u32 %s353_s25, 4  ;;  %s38_s26 = int_to_ptr.vmem [resolvable:$true] %s37_s26 }
  0x18   :  { %s313_s27 = scalar_lea.vmem %s38_s26, 1024  ;;  %p318_p11 = scmp.lt.s32.totalorder %s38_s26, %s38_s26 }
  0x19   :  { %p314_p10 = scmp.ne.s32.totalorder %s38_s26, %s313_s27  ;;  %p319_p12 = scmp.lt.s32.totalorder %s313_s27, %s313_s27 }
  0x1b   :  { %p320_p13 = por %p319_p12, %p318_p11 }
  0x1d   :  { %p321_p0 = pnand %p320_p13, %p314_p10 }
  0x1f   :  { %324 = shalt.err (!%p321_p0)
}
  0x20   :  { %s354_s1 = smov 64   ;;  %s355_s28 = smov 4  }
  0x21   :  { %43 = dma.hbm_to_vmem [thread:$0]  %s401_s2, 1024, %s38_s26, [#allocation6], %s354_s1, %s354_s1, %s355_s28  }
  0x22   :  { %345 = dma.done.wait [#allocation3], 64  }
  0x23   :  { %346 = vsyncadd [#allocation3], 4294967232 }
  0x24   :  { %347 = dma.done.wait [#allocation6], 1088  }
  0x25   :  { %348 = vsyncadd [#allocation6], 4294966208  ;;  %v356_v0 = vmov 0.0   ;;  %vm357_vm0 = vmmov 0   ;;  %v255_v1 = vld [vmem:[#allocation7 + $0x38] sm:$0xff]   ;;  %v256_v2 = vld [vmem:[#allocation7 + $0x30] sm:$0xff]   ;;  %v74_v10 = vlaneseq }
  0x26   :  { %227 = vmatprep.subr.bf16.mxu0 %v356_v0  ;;  %243 = vmatprep.mubr.msk.bf16.mxu0 %vm357_vm0, %v356_v0  ;;  %v257_v3 = vld [vmem:[#allocation7 + $0x28] sm:$0xff]   ;;  %v258_v4 = vld [vmem:[#allocation7 + $0x20] sm:$0xff]   ;;  %v259_v5 = vld [vmem:[#allocation7 + $0x18] sm:$0xff]  }
  0x27   :  { %228 = vmatpush3.bf16.msra.mxu0 %v255_v1  ;;  %v260_v6 = vld [vmem:[#allocation7 + $0x10] sm:$0xff]   ;;  %v261_v7 = vld [vmem:[#allocation7 + $0x8] sm:$0xff]   ;;  %v262_v8 = vld [vmem:[#allocation7] sm:$0xff]   ;;  %v75_v11 = vshrl.u32 %v74_v10, 7 }
  0x28   :  { %229 = vmatprep.subr.bf16.mxu0 %v356_v0  ;;  %v56_v9 = vld [vmem:[#allocation5] sm:$0xf]  ;;  %v73_v13 = vld [vmem:[%s402_s3] sm:$0x7]  ;;  %s358_s3 = smov [#allocation8]  }
  0x29   :  { %v76_v12 = vsub.s32 0, %v75_v11  ;;  %v166_v14 = vld [vmem:[#allocation2] sm:$0xf]  ;;  %v182_v32 = vsub.s32 1, %v75_v11  ;;  %v190_v35 = vsub.s32 2, %v75_v11  ;;  %s200_s5 = sshll.u32 %s358_s3, 4  ;;  %s201_s5 = int_to_ptr.vmem [resolvable:$true] %s200_s5 }
  0x2a   :  { %v167_v16 = vunpack.c.l.bf16 %v166_v14  ;;  %s325_s6 = scalar_lea.vmem %s201_s5, 128  ;;  %p330_p2 = scmp.lt.s32.totalorder %s201_s5, %s201_s5 }
  0x2b   :  { %230 = vmatpush3.bf16.msra.mxu0 %v256_v2  ;;  %v77_v15 = vrot.slane %v73_v13, %v76_v12  ;;  %v183_v33 = vrot.slane %v73_v13, %v182_v32  ;;  %v191_v37 = vrot.slane %v73_v13, %v190_v35  ;;  %p326_p1 = scmp.ne.s32.totalorder %s201_s5, %s325_s6  ;;  %p331_p3 = scmp.lt.s32.totalorder %s325_s6, %s325_s6 }
  0x2c   :  { %231 = vmatprep.subr.bf16.mxu0 %v356_v0 }
  0x2d   :  { %p332_p4 = por %p331_p3, %p330_p2 }
  0x2f   :  { %232 = vmatpush3.bf16.msra.mxu0 %v257_v3  ;;  %p333_p5 = pnand %p332_p4, %p326_p1 }
  0x30   :  { %233 = vmatprep.subr.bf16.mxu0 %v356_v0 }
  0x33   :  { %234 = vmatpush3.bf16.msra.mxu0 %v258_v4 }
  0x34   :  { %235 = vmatprep.subr.bf16.mxu0 %v356_v0 }
  0x37   :  { %236 = vmatpush3.bf16.msra.mxu0 %v259_v5 }
  0x38   :  { %237 = vmatprep.subr.bf16.mxu0 %v356_v0 }
  0x3b   :  { %238 = vmatpush3.bf16.msra.mxu0 %v260_v6 }
  0x3c   :  { %239 = vmatprep.subr.bf16.mxu0 %v356_v0 }
  0x3f   :  { %240 = vmatpush3.bf16.msra.mxu0 %v261_v7 }
  0x40   :  { %241 = vmatprep.subr.bf16.mxu0 %v356_v0 }
  0x43   :  { %242 = vmatpush3.bf16.msra.mxu0 %v262_v8 }
  0x46   :  { %244 = vmatmul.mubr.bf16.vlgmr.msra.gmra.mxu0 %v56_v9 }
 0x106   :  { %v160_v17 = vpop.f32.mrf.mxu0 }
 0x107   :  { %v161_v18 = vadd.f32 %v160_v17, %v77_v15 }
 0x108   :  { %v245_v19 = vpop.f32.mrf.mxu0 }
 0x109   :  { %v168_v20 = vadd.f32 %v167_v16, %v161_v18 }
 0x10a   :  { %v163_v21 = vpop.f32.mrf.mxu0 }
 0x10b   :  { %169 = vadd.xlane.f32.xlu0 %v168_v20  ;;  %v172_v23 = vmul.f32 %v168_v20, %v168_v20 }
 0x10c   :  { %v246_v22 = vpop.f32.mrf.mxu0 }
 0x10f   :  { %173 = vadd.xlane.f32.xlu0 %v172_v23 }
 0x194   :  { %v170_v24 = vpop.xlane.xlu0 %169 }
 0x195   :  { %v171_v25 = vmul.f32 0.03125, %v170_v24 }
 0x197   :  { %v176_v27 = vmul.f32 %v171_v25, %v171_v25  ;;  %v179_v34 = vsub.f32 %v168_v20, %v171_v25 }
 0x198   :  { %v174_v26 = vpop.xlane.xlu0 %173 }
 0x199   :  { %v175_v28 = vmul.f32 0.03125, %v174_v26  ;;  %v184_v36 = vmul.f32 %v183_v33, %v179_v34 }
 0x19b   :  { %v177_v29 = vsub.f32 %v175_v28, %v176_v27 }
 0x19d   :  { %v178_v30 = vmax.f32 %v177_v29, 0.0 }
 0x19f   :  { %v185_v31 = vadd.f32 1e-06, %v178_v30 }
 0x1a1   :  { %263 = vrsqrt.f32 %v185_v31 }
 0x1ae   :  { %v264_v38 = vpop.eup %263 }
 0x1af   :  { %v187_v39 = vmul.f32 %v264_v38, %v184_v36 }
 0x1b1   :  { %v192_v40 = vadd.f32 %v191_v37, %v187_v39 }
 0x1b3   :  { %193 = vst [vmem:[#allocation8] sm:$0xff] %v192_v40 }
 0x1b4   :  { %336 = shalt.err (!%p333_p5)
}
 0x1b5   :  { %203 = dma.vmem_to_hbm [thread:$0]  %s201_s5, 128, %s403_s4, [#allocation4]  }
 0x1b6   :  { %349 = dma.done.wait [#allocation4], 128  }
 0x1b7   :  { %350 = vsyncadd [#allocation4], 4294967168 }
 0x1b8   :  { %207 = vsyncpa [#allocation3], 1 }
 0x1b9   :  { %208 = vsyncpa [#allocation6], 1 }
 0x1ba   :  { %209 = vsyncpa [#allocation4], 1 }

</bundles_post_ra>
